<compile_context>
chip_gen: v6e
topology: v6e:2x2x1
jax: 0.10.0
libtpu: 0.0.40
codegen_flags: <defaults>
</compile_context>

<pallas_src>
import functools

import jax
import jax.numpy as jnp
from jax.experimental import pallas as pl
from jax.experimental.pallas import tpu as pltpu


_VMEM_LIMIT = 32 * 1024 * 1024  # fits v5e/v6e (128 MiB phys) and v7x (64 MiB phys)


@functools.lru_cache(maxsize=1)
def _num_tensorcores():
    """2 on dual-TC v7x, else 1 (v5e / v6e / unknown)."""
    try:
        kind = jax.devices()[0].device_kind.lower()
        if "v7" in kind or "7x" in kind:
            return 2
    except Exception:
        pass
    return 1


def _pick_tk(K):
    """Largest reduction tile <= 4096 that divides K."""
    if K <= 4096:
        return K
    for tk in (4096, 2048, 1024, 512, 256, 128):
        if K % tk == 0:
            return tk
    raise ValueError(f"Unsupported reduction size K={K}")


# ----------------------------------------------------------------------------
# Fused matmul + shift (bias/BN fold) + LeakyReLU  (conv layers 1..4, fallback)
#   out_bf16 = leaky_relu_0.2( (x @ w) + shift )
# f32 VMEM scratch accumulator, bf16 output (halves inter-layer bytes).
# ----------------------------------------------------------------------------
def _fused_matmul_kernel(x_ref, w_ref, shift_ref, o_ref, acc_ref, *, neg_slope):
    @pl.when(pl.program_id(2) == 0)
    def _():
        acc_ref[...] = jnp.zeros_like(acc_ref)

    acc_ref[...] += jnp.dot(x_ref[...], w_ref[...],
                            preferred_element_type=jnp.float32)

    @pl.when(pl.program_id(2) == pl.num_programs(2) - 1)
    def _():
        y = acc_ref[...] + shift_ref[...]
        y = jnp.where(y >= 0, y, neg_slope * y)
        o_ref[...] = y.astype(o_ref.dtype)


def fused_matmul(x, w, shift, *, neg_slope=0.2):
    """x: (M,K), w: (K,N) bf16 (N%128==0), shift: (1,N) f32 -> (M,N) bf16."""
    M, K = x.shape
    K2, N = w.shape
    assert K == K2 and N % 128 == 0

    # One M tile when possible (batch=2 workload has M <= 512 everywhere).
    M_pad = ((M + 15) // 16) * 16
    if M_pad <= 512:
        TM = M_pad
    else:
        M_pad = ((M + 255) // 256) * 256
        TM = 256
    if M_pad != M:
        x = jnp.pad(x, ((0, M_pad - M), (0, 0)))

    # Chip-conditional N split: only dual-TC v7x benefits from 2 j-tiles.
    if _num_tensorcores() >= 2 and N >= 512:
        TN = N // 2
    else:
        TN = N

    TK = _pick_tk(K)
    grid = (M_pad // TM, N // TN, K // TK)

    out = pl.pallas_call(
        functools.partial(_fused_matmul_kernel, neg_slope=neg_slope),
        out_shape=jax.ShapeDtypeStruct((M_pad, N), jnp.bfloat16),
        grid_spec=pltpu.PrefetchScalarGridSpec(
            num_scalar_prefetch=0,
            grid=grid,
            in_specs=[
                pl.BlockSpec((TM, TK), lambda i, j, k: (i, k)),
                pl.BlockSpec((TK, TN), lambda i, j, k: (k, j)),
                pl.BlockSpec((1, TN), lambda i, j, k: (0, j)),
            ],
            out_specs=pl.BlockSpec((TM, TN), lambda i, j, k: (i, j)),
            scratch_shapes=[pltpu.VMEM((TM, TN), jnp.float32)],
        ),
        compiler_params=pltpu.CompilerParams(
            dimension_semantics=("parallel", "parallel", "arbitrary"),
            vmem_limit_bytes=_VMEM_LIMIT),
    )(x.astype(jnp.bfloat16), w, shift)
    return out[:M]


# ----------------------------------------------------------------------------
# Fused conv5 (1x1 spatial) + BN/LeakyReLU + AvgPool(identity) + Linear(1024,512)
# + LeakyReLU + Dropout(eval id) + Linear(512,1)  -- single pallas_call.
# conv5 reduction (K=8192) is the grid axis; everything else lives in the
# last-step epilogue so the (N,1024) activation never touches HBM.
# ----------------------------------------------------------------------------
def _conv5_tail_kernel(p_ref, w5_ref, s5_ref, w1_ref, b1_ref, w2_ref, b2_ref,
                       o_ref, acc_ref, *, neg_slope):
    k = pl.program_id(0)

    @pl.when(k == 0)
    def _():
        acc_ref[...] = jnp.zeros_like(acc_ref)

    acc_ref[...] += jnp.dot(p_ref[...], w5_ref[...],
                            preferred_element_type=jnp.float32)

    @pl.when(k == pl.num_programs(0) - 1)
    def _():
        h = acc_ref[...] + s5_ref[...]                 # conv5 bias + BN shift
        h = jnp.where(h >= 0, h, neg_slope * h)        # LeakyReLU(0.2)
        # AdaptiveAvgPool2d(1) + Flatten: spatial is 1x1 here -> identity.
        a = jnp.dot(h.astype(jnp.bfloat16), w1_ref[...],
                    preferred_element_type=jnp.float32) + b1_ref[...]
        a = jnp.where(a >= 0, a, neg_slope * a)        # LeakyReLU(0.2)
        # Dropout(0.3): identity in eval mode.
        o_ref[...] = jnp.dot(a.astype(jnp.bfloat16), w2_ref[...],
                             preferred_element_type=jnp.float32) + b2_ref[...]


def fused_conv5_tail(p, w5, s5, w1, b1, w2, b2, *, neg_slope=0.2):
    """p: (M, 8192) conv5 patches, returns (M, 1) f32 logits."""
    M, K = p.shape
    K2, N5 = w5.shape
    assert K == K2
    H1 = w1.shape[1]
    NP = w2.shape[1]

    M_pad = ((M + 15) // 16) * 16
    if M_pad != M:
        p = jnp.pad(p, ((0, M_pad - M), (0, 0)))

    TK = _pick_tk(K)  # 4096 -> 2 K steps for conv5

    out = pl.pallas_call(
        functools.partial(_conv5_tail_kernel, neg_slope=neg_slope),
        out_shape=jax.ShapeDtypeStruct((M_pad, NP), jnp.float32),
        grid_spec=pltpu.PrefetchScalarGridSpec(
            num_scalar_prefetch=0,
            grid=(K // TK,),
            in_specs=[
                pl.BlockSpec((M_pad, TK), lambda k: (0, k)),
                pl.BlockSpec((TK, N5), lambda k: (k, 0)),
                pl.BlockSpec((1, N5), lambda k: (0, 0)),
                pl.BlockSpec((H1 * 2, H1), lambda k: (0, 0)),   # w1 (1024, 512)
                pl.BlockSpec((1, H1), lambda k: (0, 0)),
                pl.BlockSpec((H1, NP), lambda k: (0, 0)),
                pl.BlockSpec((1, NP), lambda k: (0, 0)),
            ],
            out_specs=pl.BlockSpec((M_pad, NP), lambda k: (0, 0)),
            scratch_shapes=[pltpu.VMEM((M_pad, N5), jnp.float32)],
        ),
        compiler_params=pltpu.CompilerParams(
            dimension_semantics=("arbitrary",),
            vmem_limit_bytes=_VMEM_LIMIT),
    )(p.astype(jnp.bfloat16), w5, s5, w1, b1, w2, b2)
    return out[:M, :1]


# ----------------------------------------------------------------------------
# Fallback tail (only used if conv5 output spatial != 1x1):
# Linear(1024,512) + LeakyReLU(0.2) + Dropout(eval id) + Linear(512,1)
# ----------------------------------------------------------------------------
def _tail_kernel(h_ref, w1_ref, b1_ref, w2_ref, b2_ref, o_ref, *, neg_slope):
    a = jnp.dot(h_ref[...], w1_ref[...],
                preferred_element_type=jnp.float32) + b1_ref[...]
    a = jnp.where(a >= 0, a, neg_slope * a)
    # Dropout(0.3): identity in eval mode.
    o_ref[...] = jnp.dot(a.astype(jnp.bfloat16), w2_ref[...],
                         preferred_element_type=jnp.float32) + b2_ref[...]


def fused_tail(h, w1, b1, w2, b2, *, neg_slope=0.2):
    M, K = h.shape
    M_pad = ((M + 15) // 16) * 16
    if M_pad != M:
        h = jnp.pad(h, ((0, M_pad - M), (0, 0)))
    NP = w2.shape[1]

    out = pl.pallas_call(
        functools.partial(_tail_kernel, neg_slope=neg_slope),
        out_shape=jax.ShapeDtypeStruct((M_pad, NP), jnp.float32),
        grid_spec=pltpu.PrefetchScalarGridSpec(
            num_scalar_prefetch=0,
            grid=(1,),
            in_specs=[
                pl.BlockSpec((M_pad, K), lambda i: (0, 0)),
                pl.BlockSpec(w1.shape, lambda i: (0, 0)),
                pl.BlockSpec(b1.shape, lambda i: (0, 0)),
                pl.BlockSpec(w2.shape, lambda i: (0, 0)),
                pl.BlockSpec(b2.shape, lambda i: (0, 0)),
            ],
            out_specs=pl.BlockSpec((M_pad, NP), lambda i: (0, 0)),
        ),
        compiler_params=pltpu.CompilerParams(
            dimension_semantics=("arbitrary",),
            vmem_limit_bytes=_VMEM_LIMIT),
    )(h.astype(jnp.bfloat16), w1, b1, w2, b2)
    return out[:M, :1]


# ----------------------------------------------------------------------------
# Glue: NHWC im2col, spectral norm, parameter init / preparation
# ----------------------------------------------------------------------------
def im2col_nhwc(x, kh, kw, stride, pad):
    """x: (N, H, W, C) -> patches (N*OH*OW, kh*kw*C), column order (kh, kw, c)."""
    N, H, W, C = x.shape
    xp = jnp.pad(x, ((0, 0), (pad, pad), (pad, pad), (0, 0)))
    OH = (H + 2 * pad - kh) // stride + 1
    OW = (W + 2 * pad - kw) // stride + 1
    cols = []
    for i in range(kh):
        for j in range(kw):
            cols.append(xp[:, i:i + stride * OH:stride, j:j + stride * OW:stride, :])
    patches = jnp.concatenate(cols, axis=-1)               # (N, OH, OW, kh*kw*C)
    return patches.reshape(N * OH * OW, kh * kw * C), OH, OW


def spectral_normalize(w, n_iter=30, eps=1e-12):
    """Divide a conv weight (OC, IC, KH, KW) by its largest singular value."""
    oc = w.shape[0]
    w_mat = w.reshape(oc, -1)

    def body(_, uv):
        _, v = uv
        u = w_mat @ v
        u = u / (jnp.linalg.norm(u) + eps)
        v = w_mat.T @ u
        v = v / (jnp.linalg.norm(v) + eps)
        return (u, v)

    u0 = jnp.zeros((oc,), jnp.float32)
    v0 = jnp.ones((w_mat.shape[1],), jnp.float32) / jnp.sqrt(float(w_mat.shape[1]))
    u, v = jax.lax.fori_loop(0, n_iter, body, (u0, v0))
    sigma = u @ (w_mat @ v)
    return w / sigma


CONV_CFGS = [  # (in_ch, out_ch, has_batchnorm)
    (1, 64, False),
    (64, 128, True),
    (128, 256, True),
    (256, 512, True),
    (512, 1024, True),
]


def init_params(key):
    params = {"convs": []}
    for (ic, oc, has_bn) in CONV_CFGS:
        key, k_w, k_b, k_g, k_be, k_m, k_v = jax.random.split(key, 7)
        w = 0.05 * jax.random.normal(k_w, (oc, ic, 4, 4), jnp.float32)
        b = 0.05 * jax.random.normal(k_b, (oc,), jnp.float32)
        w_sn = spectral_normalize(w)
        if has_bn:
            bn = dict(
                gamma=1.0 + 0.1 * jax.random.normal(k_g, (oc,), jnp.float32),
                beta=0.1 * jax.random.normal(k_be, (oc,), jnp.float32),
                mean=0.1 * jax.random.normal(k_m, (oc,), jnp.float32),
                var=jax.random.uniform(k_v, (oc,), jnp.float32, 0.5, 1.5),
            )
        else:
            bn = None
        params["convs"].append(dict(w=w_sn, b=b, bn=bn))

    key, k1w, k1b, k2w, k2b = jax.random.split(key, 5)
    params["fc1_w"] = 0.05 * jax.random.normal(k1w, (512, 1024), jnp.float32)
    params["fc1_b"] = 0.05 * jax.random.normal(k1b, (512,), jnp.float32)
    params["fc2_w"] = 0.05 * jax.random.normal(k2w, (1, 512), jnp.float32)
    params["fc2_b"] = 0.05 * jax.random.normal(k2b, (1,), jnp.float32)
    return params


def prepare_params(params, bn_eps=1e-5):
    """One-time weight prep: fold BN scale, NHWC ordering, lane pad, bf16 cast."""
    prep = {"convs": []}
    for layer in params["convs"]:
        w = layer["w"]                               # (OC, IC, KH, KW) f32
        oc, ic, kh, kw = w.shape
        if layer["bn"] is not None:
            bn = layer["bn"]
            inv = bn["gamma"] / jnp.sqrt(bn["var"] + bn_eps)
            shift = (layer["b"] - bn["mean"]) * inv + bn["beta"]
        else:
            inv = jnp.ones((oc,), jnp.float32)
            shift = layer["b"]
        # Column order (kh, kw, ic) matches im2col_nhwc; fold BN scale.
        w_mat = w.transpose(2, 3, 1, 0).reshape(kh * kw * ic, oc) * inv[None, :]
        n_pad = max(128, ((oc + 127) // 128) * 128)   # lane-dense output columns
        if n_pad != oc:
            w_mat = jnp.pad(w_mat, ((0, 0), (0, n_pad - oc)))
            shift = jnp.pad(shift, (0, n_pad - oc))
        prep["convs"].append(dict(
            w=w_mat.astype(jnp.bfloat16),
            shift=shift.reshape(1, n_pad).astype(jnp.float32),
            oc=oc, kh=kh, kw=kw, stride=2, pad=1))

    prep["fc1_w"] = params["fc1_w"].T.astype(jnp.bfloat16)             # (1024, 512)
    prep["fc1_b"] = params["fc1_b"].reshape(1, -1).astype(jnp.float32)
    fc2_w = params["fc2_w"].T                                          # (512, 1)
    prep["fc2_w"] = jnp.pad(fc2_w, ((0, 0), (0, 127))).astype(jnp.bfloat16)
    prep["fc2_b"] = jnp.pad(params["fc2_b"], (0, 127)).reshape(1, 128).astype(jnp.float32)
    return prep


# ----------------------------------------------------------------------------
# Forward pass
# ----------------------------------------------------------------------------
def discriminator_forward(x_nchw, prep):
    """x: (N, 1, H, W) float32 NCHW -> (N, 1) float32 logits."""
    n = x_nchw.shape[0]
    # NCHW -> NHWC once, bf16 activations from here on.
    h = jnp.transpose(x_nchw, (0, 2, 3, 1)).astype(jnp.bfloat16)

    convs = prep["convs"]
    for layer in convs[:-1]:                      # conv1..conv4 (+BN+LeakyReLU)
        patches, OH, OW = im2col_nhwc(h, layer["kh"], layer["kw"],
                                      layer["stride"], layer["pad"])
        out = fused_matmul(patches, layer["w"], layer["shift"])
        h = out[:, :layer["oc"]].reshape(n, OH, OW, layer["oc"])   # stay NHWC bf16

    # conv5 (+BN+LeakyReLU) + AdaptiveAvgPool2d(1) + Flatten + fc1/LeakyReLU/
    # Dropout/fc2.  When conv5's spatial output is 1x1 (the designed regime),
    # everything is a single fused pallas_call.
    last = convs[-1]
    patches, OH, OW = im2col_nhwc(h, last["kh"], last["kw"],
                                  last["stride"], last["pad"])
    if OH == 1 and OW == 1:
        return fused_conv5_tail(patches, last["w"], last["shift"],
                                prep["fc1_w"], prep["fc1_b"],
                                prep["fc2_w"], prep["fc2_b"])

    # General fallback: separate conv5, real average pool, then fused tail.
    out = fused_matmul(patches, last["w"], last["shift"])
    h = out[:, :last["oc"]].reshape(n, OH, OW, last["oc"])
    pooled = jnp.mean(h.astype(jnp.float32), axis=(1, 2))            # (N, 1024)
    return fused_tail(pooled, prep["fc1_w"], prep["fc1_b"],
                      prep["fc2_w"], prep["fc2_b"])


if __name__ == "__main__":
    key = jax.random.PRNGKey(0)
    key, k_in = jax.random.split(key)
    params = init_params(key)
    prep = prepare_params(params)
    # Small input: batch=2, 1 channel, 32x32 -> after 5 stride-2 convs: 1x1.
    x = jax.random.normal(k_in, (2, 1, 32, 32), jnp.float32)
    y = discriminator_forward(x, prep)
    jax.block_until_ready(y)
    assert y.shape == (2, 1), y.shape
    assert bool(jnp.all(jnp.isfinite(y)))
    print("KERNEL_OK")
</pallas_src>

<mosaic_0001>
module attributes {stable_mosaic.version = 11 : i64} {
  func.func @_fused_matmul_kernel(%arg0: i32, %arg1: i32, %arg2: i32, %arg3: memref<512x16xbf16, #tpu.memory_space<vmem>>, %arg4: memref<16x128xbf16, #tpu.memory_space<vmem>>, %arg5: memref<1x128xf32, #tpu.memory_space<vmem>>, %arg6: memref<512x128xbf16, #tpu.memory_space<vmem>>, %arg7: memref<512x128xf32, #tpu.memory_space<vmem>>) attributes {dimension_semantics = [#tpu.dimension_semantics<parallel>, #tpu.dimension_semantics<parallel>, #tpu.dimension_semantics<arbitrary>], iteration_bounds = array<i64: 1, 1, 1>, scalar_prefetch = 0 : i64, scratch_operands = 1 : i64, tpu.core_type = #tpu.core_type<tc>, window_params = [{transform_indices = @transform_0, window_bounds = array<i64: 512, 16>}, {transform_indices = @transform_1, window_bounds = array<i64: 16, 128>}, {transform_indices = @transform_2, window_bounds = array<i64: 1, 128>}, {transform_indices = @transform_3, window_bounds = array<i64: 512, 128>}]} {
    %c0_i32 = arith.constant 0 : i32
    %0 = arith.cmpi eq, %arg2, %c0_i32 : i32
    %1 = arith.extui %0 : i1 to i32
    %c0_i32_0 = arith.constant 0 : i32
    %2 = arith.cmpi ne, %1, %c0_i32_0 : i32
    scf.if %2 {
      %cst_10 = arith.constant 0.000000e+00 : f32
      %12 = vector.broadcast %cst_10 : f32 to vector<512x128xf32>
      %c0_11 = arith.constant 0 : index
      %c0_12 = arith.constant 0 : index
      %13 = vector.load %arg7[%c0_11, %c0_12] : memref<512x128xf32, #tpu.memory_space<vmem>>, vector<512x128xf32>
      tpu.vector_store %arg7[%c0_11, %c0_12], %12 {strides = array<i32>} : memref<512x128xf32, #tpu.memory_space<vmem>>, vector<512x128xf32>,
    } else {
    }
    %c0 = arith.constant 0 : index
    %c0_1 = arith.constant 0 : index
    %3 = vector.load %arg7[%c0, %c0_1] : memref<512x128xf32, #tpu.memory_space<vmem>>, vector<512x128xf32>
    %c0_2 = arith.constant 0 : index
    %c0_3 = arith.constant 0 : index
    %4 = vector.load %arg3[%c0_2, %c0_3] : memref<512x16xbf16, #tpu.memory_space<vmem>>, vector<512x16xbf16>
    %c0_4 = arith.constant 0 : index
    %c0_5 = arith.constant 0 : index
    %5 = vector.load %arg4[%c0_4, %c0_5] : memref<16x128xbf16, #tpu.memory_space<vmem>>, vector<16x128xbf16>
    %cst = arith.constant dense<0.000000e+00> : vector<512x128xf32>
    %6 = tpu.matmul %4, %5, %cst {dimension_numbers = #tpu.dot_dimension_numbers<[1], [0], [0], [1], [0, 0, 1, 1], [], []>} : vector<512x16xbf16>, vector<16x128xbf16>, vector<512x128xf32> -> vector<512x128xf32>
    %7 = arith.addf %3, %6 : vector<512x128xf32>
    %c0_6 = arith.constant 0 : index
    %c0_7 = arith.constant 0 : index
    %8 = vector.load %arg7[%c0_6, %c0_7] : memref<512x128xf32, #tpu.memory_space<vmem>>, vector<512x128xf32>
    tpu.vector_store %arg7[%c0_6, %c0_7], %7 {strides = array<i32>} : memref<512x128xf32, #tpu.memory_space<vmem>>, vector<512x128xf32>,
    %c0_i32_8 = arith.constant 0 : i32
    %9 = arith.cmpi eq, %arg2, %c0_i32_8 : i32
    %10 = arith.extui %9 : i1 to i32
    %c0_i32_9 = arith.constant 0 : i32
    %11 = arith.cmpi ne, %10, %c0_i32_9 : i32
    scf.if %11 {
      %c0_10 = arith.constant 0 : index
      %c0_11 = arith.constant 0 : index
      %12 = vector.load %arg7[%c0_10, %c0_11] : memref<512x128xf32, #tpu.memory_space<vmem>>, vector<512x128xf32>
      %c0_12 = arith.constant 0 : index
      %c0_13 = arith.constant 0 : index
      %13 = vector.load %arg5[%c0_12, %c0_13] : memref<1x128xf32, #tpu.memory_space<vmem>>, vector<1x128xf32>
      %14 = vector.broadcast %13 : vector<1x128xf32> to vector<512x128xf32>
      %15 = arith.addf %12, %14 : vector<512x128xf32>
      %cst_14 = arith.constant 0.000000e+00 : f32
      %16 = vector.broadcast %cst_14 : f32 to vector<512x128xf32>
      %17 = arith.cmpf oge, %15, %16 : vector<512x128xf32>
      %cst_15 = arith.constant 2.000000e-01 : f32
      %18 = vector.broadcast %cst_15 : f32 to vector<512x128xf32>
      %19 = arith.mulf %18, %15 : vector<512x128xf32>
      %20 = arith.select %17, %15, %19 : vector<512x128xi1>, vector<512x128xf32>
      %21 = arith.truncf %20 : vector<512x128xf32> to vector<512x128xbf16>
      %c0_16 = arith.constant 0 : index
      %c0_17 = arith.constant 0 : index
      %22 = vector.load %arg6[%c0_16, %c0_17] : memref<512x128xbf16, #tpu.memory_space<vmem>>, vector<512x128xbf16>
      tpu.vector_store %arg6[%c0_16, %c0_17], %21 {strides = array<i32>} : memref<512x128xbf16, #tpu.memory_space<vmem>>, vector<512x128xbf16>,
    } else {
    }
    return
  }
  func.func @transform_0(%arg0: i32, %arg1: i32, %arg2: i32) -> (i32, i32) {
    %c0_i32 = arith.constant 0 : i32
    return %arg0, %arg2 : i32, i32
  }
  func.func @transform_1(%arg0: i32, %arg1: i32, %arg2: i32) -> (i32, i32) {
    %c0_i32 = arith.constant 0 : i32
    return %arg2, %arg1 : i32, i32
  }
  func.func @transform_2(%arg0: i32, %arg1: i32, %arg2: i32) -> (i32, i32) {
    %c0_i32 = arith.constant 0 : i32
    %c0_i32_0 = arith.constant 0 : i32
    return %c0_i32, %arg1 : i32, i32
  }
  func.func @transform_3(%arg0: i32, %arg1: i32, %arg2: i32) -> (i32, i32) {
    %c0_i32 = arith.constant 0 : i32
    return %arg0, %arg1 : i32, i32
  }
}

</mosaic_0001>

<bundles_post_ra>
// kernel: tpu_custom_call.1
= control target key start
LH: loop header
LB: loop body
LE: loop exit
PB: predicated region body
PF: predicated region fallthrough
CT: control target
= control target key end

     0   :  { %vm380_vm0 = vcmask 130048   ;;  %s2333_s0 = inlined_call_operand.vmem [shape: bf16[512,16], index: 0, kind: input, shape index: {}]   ;;  %s2334_s1 = inlined_call_operand.vmem [shape: bf16[16,128], index: 1, kind: input, shape index: {}]   ;;  %s2335_s2 = inlined_call_operand.vmem [shape: f32[1,128], index: 2, kind: input, shape index: {}]   ;;  %s2336_s3 = inlined_call_operand.hbm [shape: bf16[512,128], index: 3, kind: output, shape index: {}]  }
   0x1   :  { %v2049_v0 = vld [vmem:[%s2334_s1] sm:$0xff]   ;;  %v2052_v3 = vld [vmem:[%s2333_s0 + $0x8] sm:$0xff]   ;;  %v2054_v5 = vld [vmem:[%s2333_s0 + $0x10] sm:$0xff]  }
   0x2   :  { %v2050_v1 = vld [vmem:[%s2333_s0] sm:$0xff]   ;;  %1978 = vmatprep.subr.bf16.mxu0 %v2049_v0  ;;  %2044 = vmatprep.subr.bf16.mxu1 %v2049_v0  ;;  %v2053_v4 = vld [vmem:[%s2333_s0 + $0x88] sm:$0xff]   ;;  %v2055_v6 = vld [vmem:[%s2333_s0 + $0x90] sm:$0xff]  }
   0x3   :  { %v2051_v2 = vld [vmem:[%s2333_s0 + $0x80] sm:$0xff]   ;;  %1979 = vmatpush3.bf16.msra.mxu0 %v2049_v0  ;;  %2045 = vmatpush3.bf16.msra.mxu1 %v2049_v0  ;;  %v2056_v7 = vld [vmem:[%s2333_s0 + $0x18] sm:$0xff]   ;;  %v2060_v11 = vld [vmem:[%s2333_s0 + $0x28] sm:$0xff]  }
   0x4   :  { %1980 = vmatprep.mubr.msk.bf16.mxu0 %vm380_vm0, %v2050_v1  ;;  %2012 = vmatprep.mubr.msk.bf16.mxu1 %vm380_vm0, %v2051_v2  ;;  %v2057_v8 = vld [vmem:[%s2333_s0 + $0x98] sm:$0xff]   ;;  %v2058_v9 = vld [vmem:[%s2333_s0 + $0x20] sm:$0xff]   ;;  %v2061_v12 = vld [vmem:[%s2333_s0 + $0xa8] sm:$0xff]  }
   0x5   :  { %v2059_v10 = vld [vmem:[%s2333_s0 + $0xa0] sm:$0xff]   ;;  %v2062_v13 = vld [vmem:[%s2333_s0 + $0x30] sm:$0xff]   ;;  %v2064_v15 = vld [vmem:[%s2333_s0 + $0x38] sm:$0xff]  }
   0x6   :  { %1981 = vmatmul.mubr.msk.bf16.vlgmr.msra.gmra.mxu0 %vm380_vm0, %v2052_v3  ;;  %2013 = vmatmul.mubr.msk.bf16.vlgmr.msra.gmra.mxu1 %vm380_vm0, %v2053_v4  ;;  %v2063_v14 = vld [vmem:[%s2333_s0 + $0xb0] sm:$0xff]   ;;  %v2065_v16 = vld [vmem:[%s2333_s0 + $0xb8] sm:$0xff]   ;;  %v2066_v17 = vld [vmem:[%s2333_s0 + $0x40] sm:$0xff]  }
   0x7   :  { %1984 = vmatprep.mubr.msk.bf16.mxu0 %vm380_vm0, %v2054_v5  ;;  %2016 = vmatprep.mubr.msk.bf16.mxu1 %vm380_vm0, %v2055_v6  ;;  %v2067_v18 = vld [vmem:[%s2333_s0 + $0xc0] sm:$0xff]  }
   0xe   :  { %1985 = vmatmul.mubr.msk.bf16.gmra.mxu0 %vm380_vm0, %v2056_v7  ;;  %2017 = vmatmul.mubr.msk.bf16.gmra.mxu1 %vm380_vm0, %v2057_v8 }
   0xf   :  { %1988 = vmatprep.mubr.msk.bf16.mxu0 %vm380_vm0, %v2058_v9  ;;  %2020 = vmatprep.mubr.msk.bf16.mxu1 %vm380_vm0, %v2059_v10 }
  0x16   :  { %1989 = vmatmul.mubr.msk.bf16.gmra.mxu0 %vm380_vm0, %v2060_v11  ;;  %2021 = vmatmul.mubr.msk.bf16.gmra.mxu1 %vm380_vm0, %v2061_v12 }
  0x17   :  { %1992 = vmatprep.mubr.msk.bf16.mxu0 %vm380_vm0, %v2062_v13  ;;  %2024 = vmatprep.mubr.msk.bf16.mxu1 %vm380_vm0, %v2063_v14 }
  0x1e   :  { %1993 = vmatmul.mubr.msk.bf16.gmra.mxu0 %vm380_vm0, %v2064_v15  ;;  %2025 = vmatmul.mubr.msk.bf16.gmra.mxu1 %vm380_vm0, %v2065_v16 }
  0x1f   :  { %1996 = vmatprep.mubr.msk.bf16.mxu0 %vm380_vm0, %v2066_v17  ;;  %2028 = vmatprep.mubr.msk.bf16.mxu1 %vm380_vm0, %v2067_v18 }
  0x20   :  { %8 = vsyncpa [#allocation4], 0  ;;  %v2068_v19 = vld [vmem:[%s2333_s0 + $0x48] sm:$0xff]   ;;  %v2070_v21 = vld [vmem:[%s2333_s0 + $0x50] sm:$0xff]  }
  0x21   :  { %v2069_v20 = vld [vmem:[%s2333_s0 + $0xc8] sm:$0xff]   ;;  %v2071_v22 = vld [vmem:[%s2333_s0 + $0xd0] sm:$0xff]   ;;  %v2072_v23 = vld [vmem:[%s2333_s0 + $0x58] sm:$0xff]  }
  0x22   :  { %v2073_v24 = vld [vmem:[%s2333_s0 + $0xd8] sm:$0xff]   ;;  %v2074_v25 = vld [vmem:[%s2333_s0 + $0x60] sm:$0xff]   ;;  %v2076_v27 = vld [vmem:[%s2333_s0 + $0x68] sm:$0xff]  }
  0x23   :  { %v2075_v26 = vld [vmem:[%s2333_s0 + $0xe0] sm:$0xff]   ;;  %v2077_v28 = vld [vmem:[%s2333_s0 + $0xe8] sm:$0xff]   ;;  %v2078_v29 = vld [vmem:[%s2333_s0 + $0x70] sm:$0xff]  }
  0x24   :  { %v2079_v30 = vld [vmem:[%s2333_s0 + $0xf0] sm:$0xff]   ;;  %v2080_v31 = vld [vmem:[%s2333_s0 + $0x78] sm:$0xff]   ;;  %v2261_v33 = vld [vmem:[%s2335_s2] ss:$0 sm:$0xff] }
  0x25   :  { %v2081_v32 = vld [vmem:[%s2333_s0 + $0xf8] sm:$0xff]   ;;  %s2104_s0 = smov [#allocation3]  }
  0x26   :  { %1997 = vmatmul.mubr.msk.bf16.gmra.mxu0 %vm380_vm0, %v2068_v19  ;;  %2029 = vmatmul.mubr.msk.bf16.gmra.mxu1 %vm380_vm0, %v2069_v20  ;;  %s1549_s2 = sshll.u32 %s2104_s0, 4  ;;  %s1550_s2 = int_to_ptr.vmem [resolvable:$true] %s1549_s2 }
  0x27   :  { %2000 = vmatprep.mubr.msk.bf16.mxu0 %vm380_vm0, %v2070_v21  ;;  %2032 = vmatprep.mubr.msk.bf16.mxu1 %vm380_vm0, %v2071_v22  ;;  %s2082_s23 = scalar_lea.vmem %s1550_s2, 4096  ;;  %p2087_p1 = scmp.lt.s32.totalorder %s1550_s2, %s1550_s2 }
  0x28   :  { %p2083_p0 = scmp.ne.s32.totalorder %s1550_s2, %s2082_s23  ;;  %p2088_p2 = scmp.lt.s32.totalorder %s2082_s23, %s2082_s23 }
  0x2a   :  { %p2089_p3 = por %p2088_p2, %p2087_p1 }
  0x2c   :  { %p2090_p4 = pnand %p2089_p3, %p2083_p0 }
  0x2e   :  { %2001 = vmatmul.mubr.msk.bf16.gmra.mxu0 %vm380_vm0, %v2072_v23  ;;  %2033 = vmatmul.mubr.msk.bf16.gmra.mxu1 %vm380_vm0, %v2073_v24 }
  0x2f   :  { %2004 = vmatprep.mubr.msk.bf16.mxu0 %vm380_vm0, %v2074_v25  ;;  %2036 = vmatprep.mubr.msk.bf16.mxu1 %vm380_vm0, %v2075_v26 }
  0x36   :  { %2005 = vmatmul.mubr.msk.bf16.gmra.mxu0 %vm380_vm0, %v2076_v27  ;;  %2037 = vmatmul.mubr.msk.bf16.gmra.mxu1 %vm380_vm0, %v2077_v28 }
  0x37   :  { %2008 = vmatprep.mubr.msk.bf16.mxu0 %vm380_vm0, %v2078_v29  ;;  %2040 = vmatprep.mubr.msk.bf16.mxu1 %vm380_vm0, %v2079_v30 }
  0x3e   :  { %2009 = vmatmul.mubr.msk.bf16.gmra.mxu0 %vm380_vm0, %v2080_v31  ;;  %2041 = vmatmul.mubr.msk.bf16.gmra.mxu1 %vm380_vm0, %v2081_v32 }
  0xc6   :  { %v1982_v34 = vpop.f32.mrf.mxu0  ;;  %v2014_v35 = vpop.f32.mrf.mxu1 }
  0xc7   :  { %v970_v36 = vadd.f32 %v1982_v34, %v2261_v33  ;;  %v1002_v37 = vadd.f32 %v2014_v35, %v2261_v33 }
  0xc8   :  { %v511_v38 = vpop.f32.mrf.mxu0  ;;  %v639_v39 = vpop.f32.mrf.mxu1 }
  0xc9   :  { %vm1034_vm1 = vcmp.ge.f32.partialorder %v970_v36, 0.0  ;;  %v1098_v40 = vmul.f32 0.2, %v970_v36  ;;  %vm1066_vm2 = vcmp.ge.f32.partialorder %v1002_v37, 0.0  ;;  %v1130_v41 = vmul.f32 0.2, %v1002_v37 }
  0xca   :  { %v968_v42 = vadd.f32 %v2261_v33, %v511_v38  ;;  %v1000_v43 = vadd.f32 %v2261_v33, %v639_v39  ;;  %v1983_v44 = vpop.f32.mrf.mxu0  ;;  %v2015_v45 = vpop.f32.mrf.mxu1 }
  0xcb   :  { %v1162_v46 = vsel %vm1034_vm1, %v970_v36, %v1098_v40  ;;  %v971_v47 = vadd.f32 %v1983_v44, %v2261_v33  ;;  %v1003_v48 = vadd.f32 %v2015_v45, %v2261_v33  ;;  %v1194_v49 = vsel %vm1066_vm2, %v1002_v37, %v1130_v41 }
  0xcc   :  { %vm1032_vm3 = vcmp.ge.f32.partialorder %v968_v42, 0.0  ;;  %v1096_v50 = vmul.f32 0.2, %v968_v42  ;;  %vm1064_vm4 = vcmp.ge.f32.partialorder %v1000_v43, 0.0  ;;  %v514_v51 = vpop.f32.mrf.mxu0  ;;  %v642_v52 = vpop.f32.mrf.mxu1  ;;  %v1128_v56 = vmul.f32 0.2, %v1000_v43 }
  0xcd   :  { %vm1035_vm5 = vcmp.ge.f32.partialorder %v971_v47, 0.0  ;;  %v1099_v53 = vmul.f32 0.2, %v971_v47  ;;  %vm1067_vm6 = vcmp.ge.f32.partialorder %v1003_v48, 0.0  ;;  %v1131_v54 = vmul.f32 0.2, %v1003_v48 }
  0xce   :  { %v1160_v55 = vsel %vm1032_vm3, %v968_v42, %v1096_v50  ;;  %v969_v57 = vadd.f32 %v2261_v33, %v514_v51  ;;  %v1001_v58 = vadd.f32 %v2261_v33, %v642_v52  ;;  %v1986_v59 = vpop.f32.mrf.mxu0  ;;  %v2018_v60 = vpop.f32.mrf.mxu1  ;;  %v1192_v8 = vsel %vm1064_vm4, %v1000_v43, %v1128_v56 }
  0xcf   :  { %v1163_v61 = vsel %vm1035_vm5, %v971_v47, %v1099_v53  ;;  %v1195_v62 = vsel %vm1067_vm6, %v1003_v48, %v1131_v54  ;;  %v974_v63 = vadd.f32 %v1986_v59, %v2261_v33  ;;  %v1006_v0 = vadd.f32 %v2018_v60, %v2261_v33 }
  0xd0   :  { %v1762_v1 = vpack.c.bf16 %v1163_v61, %v1162_v46  ;;  %v1842_v2 = vpack.c.bf16 %v1195_v62, %v1194_v49  ;;  %vm1033_vm7 = vcmp.ge.f32.partialorder %v969_v57, 0.0  ;;  %v1097_v3 = vmul.f32 0.2, %v969_v57  ;;  %v527_v4 = vpop.f32.mrf.mxu0  ;;  %v655_v5 = vpop.f32.mrf.mxu1 }
  0xd1   :  { %vm1065_vm8 = vcmp.ge.f32.partialorder %v1001_v58, 0.0  ;;  %v1129_v6 = vmul.f32 0.2, %v1001_v58  ;;  %vm1038_vm9 = vcmp.ge.f32.partialorder %v974_v63, 0.0  ;;  %v1102_v7 = vmul.f32 0.2, %v974_v63 }
  0xd2   :  { %1914 = vst [vmem:[#allocation3 + $0x8] sm:$0xff] %v1762_v1   ;;  %1930 = vst [vmem:[#allocation3 + $0x88] sm:$0xff] %v1842_v2   ;;  %v1161_v9 = vsel %vm1033_vm7, %v969_v57, %v1097_v3  ;;  %v1134_v10 = vmul.f32 0.2, %v1006_v0  ;;  %v972_v11 = vadd.f32 %v2261_v33, %v527_v4  ;;  %v1987_v12 = vpop.f32.mrf.mxu0  ;;  %v2019_v13 = vpop.f32.mrf.mxu1  ;;  %vm1070_vm10 = vcmp.ge.f32.partialorder %v1006_v0, 0.0 }
  0xd3   :  { %v1757_v14 = vpack.c.bf16 %v1161_v9, %v1160_v55  ;;  %v1193_v15 = vsel %vm1065_vm8, %v1001_v58, %v1129_v6  ;;  %v1004_v16 = vadd.f32 %v2261_v33, %v655_v5  ;;  %v1166_v18 = vsel %vm1038_vm9, %v974_v63, %v1102_v7 }
  0xd4   :  { %v1837_v17 = vpack.c.bf16 %v1193_v15, %v1192_v8  ;;  %vm1036_vm11 = vcmp.ge.f32.partialorder %v972_v11, 0.0  ;;  %v1100_v19 = vmul.f32 0.2, %v972_v11  ;;  %v530_v20 = vpop.f32.mrf.mxu0  ;;  %v658_v21 = vpop.f32.mrf.mxu1  ;;  %v975_v23 = vadd.f32 %v1987_v12, %v2261_v33 }
  0xd5   :  { %1758 = vst [vmem:[#allocation3] sm:$0xff] %v1757_v14   ;;  %vm1068_vm12 = vcmp.ge.f32.partialorder %v1004_v16, 0.0  ;;  %v1132_v22 = vmul.f32 0.2, %v1004_v16  ;;  %v1007_v24 = vadd.f32 %v2019_v13, %v2261_v33  ;;  %v1198_v25 = vsel %vm1070_vm10, %v1006_v0, %v1134_v10 }
  0xd6   :  { %1929 = vst [vmem:[#allocation3 + $0x80] sm:$0xff] %v1837_v17   ;;  %v1164_v26 = vsel %vm1036_vm11, %v972_v11, %v1100_v19  ;;  %v973_v27 = vadd.f32 %v2261_v33, %v530_v20  ;;  %v1005_v28 = vadd.f32 %v2261_v33, %v658_v21  ;;  %v1990_v29 = vpop.f32.mrf.mxu0  ;;  %v2022_v30 = vpop.f32.mrf.mxu1  ;;  %vm1039_vm13 = vcmp.ge.f32.partialorder %v975_v23, 0.0 }
  0xd7   :  { %v1196_v31 = vsel %vm1068_vm12, %v1004_v16, %v1132_v22  ;;  %v1103_v32 = vmul.f32 0.2, %v975_v23  ;;  %vm1071_vm14 = vcmp.ge.f32.partialorder %v1007_v24, 0.0  ;;  %v1135_v34 = vmul.f32 0.2, %v1007_v24 }
  0xd8   :  { %vm1037_vm15 = vcmp.ge.f32.partialorder %v973_v27, 0.0  ;;  %v1101_v35 = vmul.f32 0.2, %v973_v27  ;;  %vm1069_vm0 = vcmp.ge.f32.partialorder %v1005_v28, 0.0  ;;  %v543_v36 = vpop.f32.mrf.mxu0  ;;  %v671_v37 = vpop.f32.mrf.mxu1  ;;  %v1133_v39 = vmul.f32 0.2, %v1005_v28 }
  0xd9   :  { %v1167_v38 = vsel %vm1039_vm13, %v975_v23, %v1103_v32  ;;  %v978_v40 = vadd.f32 %v1990_v29, %v2261_v33  ;;  %v1010_v41 = vadd.f32 %v2022_v30, %v2261_v33  ;;  %v1199_v43 = vsel %vm1071_vm14, %v1007_v24, %v1135_v34 }
  0xda   :  { %v1772_v42 = vpack.c.bf16 %v1167_v38, %v1166_v18  ;;  %v1165_v44 = vsel %vm1037_vm15, %v973_v27, %v1101_v35  ;;  %v976_v45 = vadd.f32 %v2261_v33, %v543_v36  ;;  %v1991_v46 = vpop.f32.mrf.mxu0  ;;  %v2023_v47 = vpop.f32.mrf.mxu1  ;;  %v1852_v48 = vpack.c.bf16 %v1199_v43, %v1198_v25 }
  0xdb   :  { %v1767_v49 = vpack.c.bf16 %v1165_v44, %v1164_v26  ;;  %v1197_v50 = vsel %vm1069_vm0, %v1005_v28, %v1133_v39  ;;  %vm1042_vm1 = vcmp.ge.f32.partialorder %v978_v40, 0.0  ;;  %v1106_v52 = vmul.f32 0.2, %v978_v40 }
  0xdc   :  { %1916 = vst [vmem:[#allocation3 + $0x18] sm:$0xff] %v1772_v42   ;;  %v1847_v51 = vpack.c.bf16 %v1197_v50, %v1196_v31  ;;  %vm1074_vm2 = vcmp.ge.f32.partialorder %v1010_v41, 0.0  ;;  %v1138_v53 = vmul.f32 0.2, %v1010_v41  ;;  %v546_v54 = vpop.f32.mrf.mxu0  ;;  %v674_v55 = vpop.f32.mrf.mxu1  ;;  %1932 = vst [vmem:[#allocation3 + $0x98] sm:$0xff] %v1852_v48   ;;  %vm1040_vm3 = vcmp.ge.f32.partialorder %v976_v45, 0.0 }
  0xdd   :  { %1915 = vst [vmem:[#allocation3 + $0x10] sm:$0xff] %v1767_v49   ;;  %v1104_v56 = vmul.f32 0.2, %v976_v45  ;;  %v1008_v57 = vadd.f32 %v2261_v33, %v671_v37  ;;  %v979_v58 = vadd.f32 %v1991_v46, %v2261_v33  ;;  %v1170_v59 = vsel %vm1042_vm1, %v978_v40, %v1106_v52 }
  0xde   :  { %1931 = vst [vmem:[#allocation3 + $0x90] sm:$0xff] %v1847_v51   ;;  %v1202_v60 = vsel %vm1074_vm2, %v1010_v41, %v1138_v53  ;;  %v1011_v61 = vadd.f32 %v2023_v47, %v2261_v33  ;;  %v977_v62 = vadd.f32 %v2261_v33, %v546_v54  ;;  %v1994_v63 = vpop.f32.mrf.mxu0  ;;  %v2026_v0 = vpop.f32.mrf.mxu1  ;;  %v1009_v9 = vadd.f32 %v2261_v33, %v674_v55 }
  0xdf   :  { %v1168_v1 = vsel %vm1040_vm3, %v976_v45, %v1104_v56  ;;  %vm1072_vm4 = vcmp.ge.f32.partialorder %v1008_v57, 0.0  ;;  %v1136_v2 = vmul.f32 0.2, %v1008_v57  ;;  %vm1043_vm5 = vcmp.ge.f32.partialorder %v979_v58, 0.0 }
  0xe0   :  { %v1107_v3 = vmul.f32 0.2, %v979_v58  ;;  %vm1075_vm6 = vcmp.ge.f32.partialorder %v1011_v61, 0.0  ;;  %v1139_v4 = vmul.f32 0.2, %v1011_v61  ;;  %vm1041_vm7 = vcmp.ge.f32.partialorder %v977_v62, 0.0  ;;  %v559_v5 = vpop.f32.mrf.mxu0  ;;  %v687_v6 = vpop.f32.mrf.mxu1 }
  0xe1   :  { %v1200_v7 = vsel %vm1072_vm4, %v1008_v57, %v1136_v2  ;;  %v1105_v8 = vmul.f32 0.2, %v977_v62  ;;  %v982_v10 = vadd.f32 %v1994_v63, %v2261_v33  ;;  %v1014_v13 = vadd.f32 %v2026_v0, %v2261_v33 }
  0xe2   :  { %v1171_v11 = vsel %vm1043_vm5, %v979_v58, %v1107_v3  ;;  %v1203_v12 = vsel %vm1075_vm6, %v1011_v61, %v1139_v4  ;;  %v980_v14 = vadd.f32 %v2261_v33, %v559_v5  ;;  %v1995_v15 = vpop.f32.mrf.mxu0  ;;  %v2027_v16 = vpop.f32.mrf.mxu1  ;;  %vm1073_vm8 = vcmp.ge.f32.partialorder %v1009_v9, 0.0 }
  0xe3   :  { %v1782_v17 = vpack.c.bf16 %v1171_v11, %v1170_v59  ;;  %v1862_v18 = vpack.c.bf16 %v1203_v12, %v1202_v60  ;;  %v1169_v19 = vsel %vm1041_vm7, %v977_v62, %v1105_v8  ;;  %v1137_v21 = vmul.f32 0.2, %v1009_v9 }
  0xe4   :  { %v1777_v20 = vpack.c.bf16 %v1169_v19, %v1168_v1  ;;  %vm1046_vm9 = vcmp.ge.f32.partialorder %v982_v10, 0.0  ;;  %v1110_v22 = vmul.f32 0.2, %v982_v10  ;;  %v562_v23 = vpop.f32.mrf.mxu0  ;;  %v690_v24 = vpop.f32.mrf.mxu1  ;;  %vm1078_vm10 = vcmp.ge.f32.partialorder %v1014_v13, 0.0 }
  0xe5   :  { %1918 = vst [vmem:[#allocation3 + $0x28] sm:$0xff] %v1782_v17   ;;  %1934 = vst [vmem:[#allocation3 + $0xa8] sm:$0xff] %v1862_v18   ;;  %v1142_v25 = vmul.f32 0.2, %v1014_v13  ;;  %vm1044_vm11 = vcmp.ge.f32.partialorder %v980_v14, 0.0  ;;  %v1201_v27 = vsel %vm1073_vm8, %v1009_v9, %v1137_v21  ;;  %v1012_v29 = vadd.f32 %v2261_v33, %v687_v6 }
  0xe6   :  { %v1108_v26 = vmul.f32 0.2, %v980_v14  ;;  %1917 = vst [vmem:[#allocation3 + $0x20] sm:$0xff] %v1777_v20   ;;  %v1174_v28 = vsel %vm1046_vm9, %v982_v10, %v1110_v22  ;;  %v983_v30 = vadd.f32 %v1995_v15, %v2261_v33  ;;  %v1998_v31 = vpop.f32.mrf.mxu0  ;;  %v2030_v32 = vpop.f32.mrf.mxu1  ;;  %v1857_v34 = vpack.c.bf16 %v1201_v27, %v1200_v7 }
  0xe7   :  { %v1206_v35 = vsel %vm1078_vm10, %v1014_v13, %v1142_v25  ;;  %v1015_v37 = vadd.f32 %v2027_v16, %v2261_v33  ;;  %vm1076_vm12 = vcmp.ge.f32.partialorder %v1012_v29, 0.0  ;;  %v1140_v38 = vmul.f32 0.2, %v1012_v29 }
  0xe8   :  { %v1172_v36 = vsel %vm1044_vm11, %v980_v14, %v1108_v26  ;;  %vm1047_vm13 = vcmp.ge.f32.partialorder %v983_v30, 0.0  ;;  %v1111_v39 = vmul.f32 0.2, %v983_v30  ;;  %v575_v40 = vpop.f32.mrf.mxu0  ;;  %v703_v41 = vpop.f32.mrf.mxu1  ;;  %1933 = vst [vmem:[#allocation3 + $0xa0] sm:$0xff] %v1857_v34   ;;  %v981_v43 = vadd.f32 %v2261_v33, %v562_v23 }
  0xe9   :  { %vm1079_vm14 = vcmp.ge.f32.partialorder %v1015_v37, 0.0  ;;  %v1143_v42 = vmul.f32 0.2, %v1015_v37  ;;  %v1013_v44 = vadd.f32 %v2261_v33, %v690_v24  ;;  %v1204_v45 = vsel %vm1076_vm12, %v1012_v29, %v1140_v38 }
  0xea   :  { %v1175_v46 = vsel %vm1047_vm13, %v983_v30, %v1111_v39  ;;  %v986_v47 = vadd.f32 %v1998_v31, %v2261_v33  ;;  %v1018_v48 = vadd.f32 %v2030_v32, %v2261_v33  ;;  %v1999_v49 = vpop.f32.mrf.mxu0  ;;  %v2031_v50 = vpop.f32.mrf.mxu1  ;;  %vm1045_vm15 = vcmp.ge.f32.partialorder %v981_v43, 0.0 }
  0xeb   :  { %v1792_v51 = vpack.c.bf16 %v1175_v46, %v1174_v28  ;;  %v1207_v52 = vsel %vm1079_vm14, %v1015_v37, %v1143_v42  ;;  %v1109_v53 = vmul.f32 0.2, %v981_v43  ;;  %vm1077_vm0 = vcmp.ge.f32.partialorder %v1013_v44, 0.0 }
  0xec   :  { %v1872_v54 = vpack.c.bf16 %v1207_v52, %v1206_v35  ;;  %v1141_v55 = vmul.f32 0.2, %v1013_v44  ;;  %vm1050_vm1 = vcmp.ge.f32.partialorder %v986_v47, 0.0  ;;  %v578_v56 = vpop.f32.mrf.mxu0  ;;  %v706_v57 = vpop.f32.mrf.mxu1  ;;  %v1114_v59 = vmul.f32 0.2, %v986_v47 }
  0xed   :  { %1920 = vst [vmem:[#allocation3 + $0x38] sm:$0xff] %v1792_v51   ;;  %v1173_v58 = vsel %vm1045_vm15, %v981_v43, %v1109_v53  ;;  %vm1082_vm2 = vcmp.ge.f32.partialorder %v1018_v48, 0.0  ;;  %v1146_v60 = vmul.f32 0.2, %v1018_v48  ;;  %v984_v63 = vadd.f32 %v2261_v33, %v575_v40 }
  0xee   :  { %1936 = vst [vmem:[#allocation3 + $0xb8] sm:$0xff] %v1872_v54   ;;  %v1787_v61 = vpack.c.bf16 %v1173_v58, %v1172_v36  ;;  %v1205_v62 = vsel %vm1077_vm0, %v1013_v44, %v1141_v55  ;;  %v1016_v0 = vadd.f32 %v2261_v33, %v703_v41  ;;  %v2002_v1 = vpop.f32.mrf.mxu0  ;;  %v2034_v2 = vpop.f32.mrf.mxu1  ;;  %v1178_v4 = vsel %vm1050_vm1, %v986_v47, %v1114_v59 }
  0xef   :  { %v1867_v3 = vpack.c.bf16 %v1205_v62, %v1204_v45  ;;  %v1210_v5 = vsel %vm1082_vm2, %v1018_v48, %v1146_v60  ;;  %v987_v6 = vadd.f32 %v1999_v49, %v2261_v33  ;;  %vm1048_vm3 = vcmp.ge.f32.partialorder %v984_v63, 0.0 }
  0xf0   :  { %1919 = vst [vmem:[#allocation3 + $0x30] sm:$0xff] %v1787_v61   ;;  %v1112_v7 = vmul.f32 0.2, %v984_v63  ;;  %vm1080_vm4 = vcmp.ge.f32.partialorder %v1016_v0, 0.0  ;;  %v1144_v8 = vmul.f32 0.2, %v1016_v0  ;;  %v591_v9 = vpop.f32.mrf.mxu0  ;;  %v719_v10 = vpop.f32.mrf.mxu1  ;;  %v1019_v12 = vadd.f32 %v2031_v50, %v2261_v33 }
  0xf1   :  { %1935 = vst [vmem:[#allocation3 + $0xb0] sm:$0xff] %v1867_v3   ;;  %vm1051_vm5 = vcmp.ge.f32.partialorder %v987_v6, 0.0  ;;  %v1115_v11 = vmul.f32 0.2, %v987_v6  ;;  %v985_v13 = vadd.f32 %v2261_v33, %v578_v56  ;;  %v1017_v16 = vadd.f32 %v2261_v33, %v706_v57 }
  0xf2   :  { %v1176_v14 = vsel %vm1048_vm3, %v984_v63, %v1112_v7  ;;  %v1208_v15 = vsel %vm1080_vm4, %v1016_v0, %v1144_v8  ;;  %v990_v17 = vadd.f32 %v2002_v1, %v2261_v33  ;;  %v2003_v18 = vpop.f32.mrf.mxu0  ;;  %v2035_v19 = vpop.f32.mrf.mxu1  ;;  %vm1083_vm6 = vcmp.ge.f32.partialorder %v1019_v12, 0.0 }
  0xf3   :  { %v1179_v20 = vsel %vm1051_vm5, %v987_v6, %v1115_v11  ;;  %v1147_v21 = vmul.f32 0.2, %v1019_v12  ;;  %vm1049_vm7 = vcmp.ge.f32.partialorder %v985_v13, 0.0  ;;  %v1113_v23 = vmul.f32 0.2, %v985_v13 }
  0xf4   :  { %v1802_v22 = vpack.c.bf16 %v1179_v20, %v1178_v4  ;;  %vm1081_vm8 = vcmp.ge.f32.partialorder %v1017_v16, 0.0  ;;  %v1145_v24 = vmul.f32 0.2, %v1017_v16  ;;  %v594_v25 = vpop.f32.mrf.mxu0  ;;  %v722_v26 = vpop.f32.mrf.mxu1  ;;  %vm1054_vm9 = vcmp.ge.f32.partialorder %v990_v17, 0.0 }
  0xf5   :  { %v1211_v27 = vsel %vm1083_vm6, %v1019_v12, %v1147_v21  ;;  %v1118_v28 = vmul.f32 0.2, %v990_v17  ;;  %v1022_v29 = vadd.f32 %v2034_v2, %v2261_v33  ;;  %v1177_v31 = vsel %vm1049_vm7, %v985_v13, %v1113_v23 }
  0xf6   :  { %1922 = vst [vmem:[#allocation3 + $0x48] sm:$0xff] %v1802_v22   ;;  %v1882_v30 = vpack.c.bf16 %v1211_v27, %v1210_v5  ;;  %v1209_v32 = vsel %vm1081_vm8, %v1017_v16, %v1145_v24  ;;  %v988_v34 = vadd.f32 %v2261_v33, %v591_v9  ;;  %v2006_v35 = vpop.f32.mrf.mxu0  ;;  %v2038_v36 = vpop.f32.mrf.mxu1  ;;  %v1797_v37 = vpack.c.bf16 %v1177_v31, %v1176_v14 }
  0xf7   :  { %v1877_v38 = vpack.c.bf16 %v1209_v32, %v1208_v15  ;;  %v1182_v39 = vsel %vm1054_vm9, %v990_v17, %v1118_v28  ;;  %vm1086_vm10 = vcmp.ge.f32.partialorder %v1022_v29, 0.0  ;;  %v1150_v40 = vmul.f32 0.2, %v1022_v29 }
  0xf8   :  { %1938 = vst [vmem:[#allocation3 + $0xc8] sm:$0xff] %v1882_v30   ;;  %vm1052_vm11 = vcmp.ge.f32.partialorder %v988_v34, 0.0  ;;  %v1116_v41 = vmul.f32 0.2, %v988_v34  ;;  %v1020_v42 = vadd.f32 %v2261_v33, %v719_v10  ;;  %v607_v43 = vpop.f32.mrf.mxu0  ;;  %v735_v44 = vpop.f32.mrf.mxu1  ;;  %1921 = vst [vmem:[#allocation3 + $0x40] sm:$0xff] %v1797_v37   ;;  %v991_v45 = vadd.f32 %v2003_v18, %v2261_v33 }
  0xf9   :  { %1937 = vst [vmem:[#allocation3 + $0xc0] sm:$0xff] %v1877_v38   ;;  %v1023_v46 = vadd.f32 %v2035_v19, %v2261_v33  ;;  %v989_v47 = vadd.f32 %v2261_v33, %v594_v25  ;;  %v1021_v48 = vadd.f32 %v2261_v33, %v722_v26  ;;  %v1214_v49 = vsel %vm1086_vm10, %v1022_v29, %v1150_v40 }
  0xfa   :  { %v1180_v50 = vsel %vm1052_vm11, %v988_v34, %v1116_v41  ;;  %vm1084_vm12 = vcmp.ge.f32.partialorder %v1020_v42, 0.0  ;;  %v1148_v51 = vmul.f32 0.2, %v1020_v42  ;;  %v2007_v52 = vpop.f32.mrf.mxu0  ;;  %v2039_v53 = vpop.f32.mrf.mxu1  ;;  %vm1055_vm13 = vcmp.ge.f32.partialorder %v991_v45, 0.0 }
  0xfb   :  { %v1119_v54 = vmul.f32 0.2, %v991_v45  ;;  %vm1087_vm14 = vcmp.ge.f32.partialorder %v1023_v46, 0.0  ;;  %v1151_v55 = vmul.f32 0.2, %v1023_v46  ;;  %vm1053_vm15 = vcmp.ge.f32.partialorder %v989_v47, 0.0 }
  0xfc   :  { %v1212_v56 = vsel %vm1084_vm12, %v1020_v42, %v1148_v51  ;;  %v1117_v57 = vmul.f32 0.2, %v989_v47  ;;  %vm1085_vm0 = vcmp.ge.f32.partialorder %v1021_v48, 0.0  ;;  %v610_v58 = vpop.f32.mrf.mxu0  ;;  %v738_v59 = vpop.f32.mrf.mxu1  ;;  %v1149_v62 = vmul.f32 0.2, %v1021_v48 }
  0xfd   :  { %v1183_v60 = vsel %vm1055_vm13, %v991_v45, %v1119_v54  ;;  %v1215_v61 = vsel %vm1087_vm14, %v1023_v46, %v1151_v55  ;;  %v994_v63 = vadd.f32 %v2006_v35, %v2261_v33  ;;  %v1026_v3 = vadd.f32 %v2038_v36, %v2261_v33 }
  0xfe   :  { %v1812_v0 = vpack.c.bf16 %v1183_v60, %v1182_v39  ;;  %v1892_v1 = vpack.c.bf16 %v1215_v61, %v1214_v49  ;;  %v1181_v2 = vsel %vm1053_vm15, %v989_v47, %v1117_v57  ;;  %v2010_v4 = vpop.f32.mrf.mxu0  ;;  %v2042_v5 = vpop.f32.mrf.mxu1  ;;  %v1213_v7 = vsel %vm1085_vm0, %v1021_v48, %v1149_v62 }
  0xff   :  { %v1807_v6 = vpack.c.bf16 %v1181_v2, %v1180_v50  ;;  %vm1058_vm1 = vcmp.ge.f32.partialorder %v994_v63, 0.0  ;;  %v1122_v8 = vmul.f32 0.2, %v994_v63  ;;  %v1887_v9 = vpack.c.bf16 %v1213_v7, %v1212_v56 }
 0x100   :  { %1924 = vst [vmem:[#allocation3 + $0x58] sm:$0xff] %v1812_v0   ;;  %1940 = vst [vmem:[#allocation3 + $0xd8] sm:$0xff] %v1892_v1   ;;  %vm1090_vm2 = vcmp.ge.f32.partialorder %v1026_v3, 0.0  ;;  %v1154_v10 = vmul.f32 0.2, %v1026_v3  ;;  %v992_v11 = vadd.f32 %v2261_v33, %v607_v43  ;;  %v1024_v12 = vadd.f32 %v2261_v33, %v735_v44  ;;  %v623_v18 = vpop.f32.mrf.mxu0  ;;  %v751_v19 = vpop.f32.mrf.mxu1 }
 0x101   :  { %1923 = vst [vmem:[#allocation3 + $0x50] sm:$0xff] %v1807_v6   ;;  %v995_v13 = vadd.f32 %v2007_v52, %v2261_v33  ;;  %v1027_v14 = vadd.f32 %v2039_v53, %v2261_v33  ;;  %1939 = vst [vmem:[#allocation3 + $0xd0] sm:$0xff] %v1887_v9   ;;  %v1186_v15 = vsel %vm1058_vm1, %v994_v63, %v1122_v8 }
 0x102   :  { %vm1056_vm3 = vcmp.ge.f32.partialorder %v992_v11, 0.0  ;;  %v1120_v16 = vmul.f32 0.2, %v992_v11  ;;  %v993_v17 = vadd.f32 %v2261_v33, %v610_v58  ;;  %v1218_v20 = vsel %vm1090_vm2, %v1026_v3, %v1154_v10  ;;  %v2011_v32 = vpop.f32.mrf.mxu0  ;;  %v2043_v34 = vpop.f32.mrf.mxu1 }
 0x103   :  { %vm1088_vm4 = vcmp.ge.f32.partialorder %v1024_v12, 0.0  ;;  %vm1059_vm5 = vcmp.ge.f32.partialorder %v995_v13, 0.0  ;;  %v1123_v21 = vmul.f32 0.2, %v995_v13  ;;  %v1152_v22 = vmul.f32 0.2, %v1024_v12 }
 0x104   :  { %vm1091_vm6 = vcmp.ge.f32.partialorder %v1027_v14, 0.0  ;;  %v1155_v23 = vmul.f32 0.2, %v1027_v14  ;;  %vm1057_vm7 = vcmp.ge.f32.partialorder %v993_v17, 0.0  ;;  %v1184_v24 = vsel %vm1056_vm3, %v992_v11, %v1120_v16  ;;  %v626_v48 = vpop.f32.mrf.mxu0  ;;  %v754_v49 = vpop.f32.mrf.mxu1 }
 0x105   :  { %v1187_v25 = vsel %vm1059_vm5, %v995_v13, %v1123_v21  ;;  %v1121_v26 = vmul.f32 0.2, %v993_v17  ;;  %v1025_v27 = vadd.f32 %v2261_v33, %v738_v59  ;;  %v998_v30 = vadd.f32 %v2010_v4, %v2261_v33 }
 0x106   :  { %v1822_v28 = vpack.c.bf16 %v1187_v25, %v1186_v15  ;;  %v1219_v29 = vsel %vm1091_vm6, %v1027_v14, %v1155_v23  ;;  %v1030_v31 = vadd.f32 %v2042_v5, %v2261_v33  ;;  %v1216_v38 = vsel %vm1088_vm4, %v1024_v12, %v1152_v22 }
 0x107   :  { %v1902_v35 = vpack.c.bf16 %v1219_v29, %v1218_v20  ;;  %v1185_v36 = vsel %vm1057_vm7, %v993_v17, %v1121_v26  ;;  %vm1089_vm8 = vcmp.ge.f32.partialorder %v1025_v27, 0.0  ;;  %v1153_v37 = vmul.f32 0.2, %v1025_v27 }
 0x108   :  { %1926 = vst [vmem:[#allocation3 + $0x68] sm:$0xff] %v1822_v28   ;;  %v1817_v39 = vpack.c.bf16 %v1185_v36, %v1184_v24  ;;  %vm1062_vm9 = vcmp.ge.f32.partialorder %v998_v30, 0.0  ;;  %v1126_v40 = vmul.f32 0.2, %v998_v30  ;;  %vm1094_vm10 = vcmp.ge.f32.partialorder %v1030_v31, 0.0 }
 0x109   :  { %1942 = vst [vmem:[#allocation3 + $0xe8] sm:$0xff] %v1902_v35   ;;  %v1217_v41 = vsel %vm1089_vm8, %v1025_v27, %v1153_v37  ;;  %v1158_v42 = vmul.f32 0.2, %v1030_v31  ;;  %v996_v43 = vadd.f32 %v2261_v33, %v623_v18  ;;  %v1028_v45 = vadd.f32 %v2261_v33, %v751_v19 }
 0x10a   :  { %1925 = vst [vmem:[#allocation3 + $0x60] sm:$0xff] %v1817_v39   ;;  %v1897_v44 = vpack.c.bf16 %v1217_v41, %v1216_v38  ;;  %v999_v46 = vadd.f32 %v2011_v32, %v2261_v33  ;;  %v1031_v47 = vadd.f32 %v2043_v34, %v2261_v33  ;;  %v1190_v50 = vsel %vm1062_vm9, %v998_v30, %v1126_v40 }
 0x10b   :  { %v1222_v51 = vsel %vm1094_vm10, %v1030_v31, %v1158_v42  ;;  %v1124_v53 = vmul.f32 0.2, %v996_v43  ;;  %v997_v55 = vadd.f32 %v2261_v33, %v626_v48  ;;  %v1029_v56 = vadd.f32 %v2261_v33, %v754_v49 }
 0x10c   :  { %1941 = vst [vmem:[#allocation3 + $0xe0] sm:$0xff] %v1897_v44   ;;  %vm1063_vm11 = vcmp.ge.f32.partialorder %v999_v46, 0.0  ;;  %v1127_v52 = vmul.f32 0.2, %v999_v46  ;;  %vm1095_vm12 = vcmp.ge.f32.partialorder %v1031_v47, 0.0  ;;  %vm1060_vm13 = vcmp.ge.f32.partialorder %v996_v43, 0.0 }
 0x10d   :  { %v1159_v54 = vmul.f32 0.2, %v1031_v47  ;;  %vm1092_vm14 = vcmp.ge.f32.partialorder %v1028_v45, 0.0  ;;  %v1156_v57 = vmul.f32 0.2, %v1028_v45  ;;  %vm1061_vm15 = vcmp.ge.f32.partialorder %v997_v55, 0.0 }
 0x10e   :  { %v1191_v58 = vsel %vm1063_vm11, %v999_v46, %v1127_v52  ;;  %v1125_v61 = vmul.f32 0.2, %v997_v55  ;;  %vm1093_vm0 = vcmp.ge.f32.partialorder %v1029_v56, 0.0  ;;  %v1157_v63 = vmul.f32 0.2, %v1029_v56 }
 0x10f   :  { %v1832_v59 = vpack.c.bf16 %v1191_v58, %v1190_v50  ;;  %v1223_v60 = vsel %vm1095_vm12, %v1031_v47, %v1159_v54  ;;  %v1188_v0 = vsel %vm1060_vm13, %v996_v43, %v1124_v53  ;;  %v1220_v2 = vsel %vm1092_vm14, %v1028_v45, %v1156_v57 }
 0x110   :  { %v1912_v62 = vpack.c.bf16 %v1223_v60, %v1222_v51  ;;  %v1189_v1 = vsel %vm1061_vm15, %v997_v55, %v1125_v61  ;;  %v1221_v33 = vsel %vm1093_vm0, %v1029_v56, %v1157_v63 }
 0x111   :  { %1928 = vst [vmem:[#allocation3 + $0x78] sm:$0xff] %v1832_v59   ;;  %v1827_v3 = vpack.c.bf16 %v1189_v1, %v1188_v0  ;;  %v1907_v4 = vpack.c.bf16 %v1221_v33, %v1220_v2 }
 0x112   :  { %1944 = vst [vmem:[#allocation3 + $0xf8] sm:$0xff] %v1912_v62  }
 0x113   :  { %1927 = vst [vmem:[#allocation3 + $0x70] sm:$0xff] %v1827_v3   ;;  %1943 = vst [vmem:[#allocation3 + $0xf0] sm:$0xff] %v1907_v4  }
 0x114   :  { %2093 = shalt.err (!%p2090_p4)
}
 0x115   :  { %s2105_s24 = smov 64   ;;  %s2106_s25 = smov 4  }
 0x116   :  { %1555 = dma.vmem_to_hbm [thread:$0]  %s1550_s2, 4096, %s2336_s3, [#allocation4], %s2105_s24, %s2105_s24, %s2106_s25  }
 0x117   :  { %2102 = dma.done.wait [#allocation4], 4096  }
 0x118   :  { %2103 = vsyncadd [#allocation4], 4294963200 }
 0x119   :  { %1559 = vsyncpa [#allocation4], 1 }

</bundles_post_ra>
